<compile_context>
chip_gen: v7x
topology: tpu7x:2x2x1
jax: 0.10.0
libtpu: 0.0.40
codegen_flags: <defaults>
</compile_context>

<pallas_src>
import functools

import numpy as np
import jax
import jax.numpy as jnp
from jax import lax
from jax.experimental import pallas as pl
from jax.experimental.pallas import tpu as pltpu

_NEG = -1e30  # finite "-inf": keeps the masked online logsumexp NaN-free


def _dot_abt(a, b):
    """a @ b.T expressed as a dot_general (no transpose materialized)."""
    return lax.dot_general(a, b, dimension_numbers=(((1,), (1,)), ((), ())),
                           preferred_element_type=jnp.float32)


def _row_lse(logits):
    m = jnp.max(logits, axis=1, keepdims=True)
    return jnp.log(jnp.sum(jnp.exp(logits - m), axis=1, keepdims=True)) + m


def _kd_clip_kernel(B, D, tm, Bp, Dp, mxu_dtype,
                    scale_ref, cross_ref,
                    img_ref, txt_ref, t_img_ref, t_txt_ref,
                    task_ref, fd_ref, icl_ref,
                    ntxt_ref, cmax_ref, csum_ref, acc_ref):
    i = pl.program_id(0)
    n_tiles = pl.num_programs(0)
    row0 = pl.multiple_of(i * tm, 8)
    padded = Bp > B  # static python bool

    logit_scale = scale_ref[0, 0]
    cross_scale = cross_ref[0, 0]

    # ---- step 0: normalize the full text features once (kept resident in a
    # VMEM scratch for every row tile) and clear the accumulators.
    @pl.when(i == 0)
    def _init():
        txt = txt_ref[...].astype(jnp.float32)
        ssq = jnp.sum(txt * txt, axis=1, keepdims=True)
        ntxt = txt * lax.rsqrt(jnp.maximum(ssq, 1e-24))  # == F.normalize(eps=1e-12)
        ntxt_ref[...] = ntxt.astype(mxu_dtype)
        cmax_ref[...] = jnp.full((1, Bp), _NEG, dtype=jnp.float32)
        csum_ref[...] = jnp.zeros((1, Bp), dtype=jnp.float32)
        for k in range(5):
            acc_ref[k] = jnp.float32(0.0)

    # ---- this tile's student image rows, normalized in f32 (rsqrt -> EUP)
    img = img_ref[...].astype(jnp.float32)
    issq = jnp.sum(img * img, axis=1, keepdims=True)
    nimg = img * lax.rsqrt(jnp.maximum(issq, 1e-24))            # (tm, Dp) f32

    ntxt_tile = ntxt_ref[pl.ds(row0, tm), :]                    # (tm, Dp) mxu_dtype
    ntxt_tile_f32 = ntxt_tile.astype(jnp.float32)
    t_img_tile = t_img_ref[pl.ds(row0, tm), :].astype(jnp.float32)
    t_txt_tile = t_txt_ref[pl.ds(row0, tm), :].astype(jnp.float32)

    # validity masks for padded rows/columns (compiled out when not padded)
    if padded:
        rid = lax.broadcasted_iota(jnp.int32, (tm, Bp), 0) + row0
        cid = lax.broadcasted_iota(jnp.int32, (tm, Bp), 1)
        pair_valid = jnp.logical_and(rid < B, cid < B)
        row_valid = (lax.broadcasted_iota(jnp.int32, (tm, 1), 0) + row0 < B
                     ).astype(jnp.float32)
        col_valid = (lax.broadcasted_iota(jnp.int32, (1, Bp), 1) < B
                     ).astype(jnp.float32)
    else:
        pair_valid = row_valid = col_valid = None

    def mask(l):
        return l if pair_valid is None else jnp.where(pair_valid, l, _NEG)

    def rsum(x):  # sum of a (tm, 1) column over the *valid* rows only
        return jnp.sum(x if row_valid is None else x * row_valid)

    # ---- task loss: scale folded into the (tm, D) LHS; diagonal taken
    # directly from the features (no iota/eye, no B x B transpose).
    lhs_task = (logit_scale * nimg).astype(mxu_dtype)
    logits = mask(_dot_abt(lhs_task, ntxt_ref[...]))            # (tm, Bp) f32
    diag = jnp.sum(lhs_task.astype(jnp.float32) * ntxt_tile_f32,
                   axis=1, keepdims=True)                       # (tm, 1)
    acc_ref[0] = acc_ref[0] + rsum(_row_lse(logits) - diag)     # image-side CE
    acc_ref[1] = acc_ref[1] + rsum(diag)                        # shared diagonal

    # text-side CE: online logsumexp over the row axis (the columns of
    # `logits`) instead of materializing logits.T
    tile_max = jnp.max(logits, axis=0, keepdims=True)           # (1, Bp)
    new_max = jnp.maximum(cmax_ref[...], tile_max)
    tile_sum = jnp.sum(jnp.exp(logits - new_max), axis=0, keepdims=True)
    csum_ref[...] = csum_ref[...] * jnp.exp(cmax_ref[...] - new_max) + tile_sum
    cmax_ref[...] = new_max

    # ---- inter-modal contrastive distillation (row-side CE only)
    lhs_i1 = (cross_scale * nimg).astype(mxu_dtype)
    l1 = mask(_dot_abt(lhs_i1, t_txt_ref[...]))
    d1 = jnp.sum(lhs_i1.astype(jnp.float32) * t_txt_tile, axis=1, keepdims=True)
    acc_ref[2] = acc_ref[2] + rsum(_row_lse(l1) - d1)

    lhs_i2 = (cross_scale * ntxt_tile_f32).astype(mxu_dtype)
    l2 = mask(_dot_abt(lhs_i2, t_img_ref[...]))
    d2 = jnp.sum(lhs_i2.astype(jnp.float32) * t_img_tile, axis=1, keepdims=True)
    acc_ref[3] = acc_ref[3] + rsum(_row_lse(l2) - d2)

    # ---- feature-distillation MSE partial sums (padded rows/cols are 0 - 0)
    di = nimg - t_img_tile
    dt = ntxt_tile_f32 - t_txt_tile
    acc_ref[4] = acc_ref[4] + jnp.sum(di * di) + jnp.sum(dt * dt)

    # ---- finalize on the last row tile
    @pl.when(i == n_tiles - 1)
    def _fin():
        col_lse = jnp.log(csum_ref[...]) + cmax_ref[...]        # (1, Bp)
        col_lse_sum = jnp.sum(col_lse if col_valid is None else col_lse * col_valid)
        inv_b = jnp.float32(1.0 / B)
        ce_img = acc_ref[0] * inv_b
        ce_txt = (col_lse_sum - acc_ref[1]) * inv_b
        task_ref[0, 0] = 0.5 * (ce_img + ce_txt)
        fd_ref[0, 0] = acc_ref[4] * jnp.float32(1.0 / (B * D))
        icl_ref[0, 0] = 0.5 * (acc_ref[2] + acc_ref[3]) * inv_b


def kd_clip_loss(image_features, text_features, logit_scale,
                 t_image_features, t_text_features, cross_logit_scale,
                 *, block_rows=None):
    """Single-device KDClipLoss forward. Returns (task_loss, fd_loss, icl_loss)."""
    B, D = image_features.shape
    feat_dtype = image_features.dtype
    # All MXU operands share the student feature dtype: native-dtype DMA, and
    # bf16 inputs hit the 2x bf16 MXU path (accumulation stays f32).
    mxu_dtype = jnp.bfloat16 if feat_dtype == jnp.bfloat16 else jnp.float32

    text_features = text_features.astype(feat_dtype)
    t_image_features = t_image_features.astype(feat_dtype)
    t_text_features = t_text_features.astype(feat_dtype)

    # lane-dense feature axis, sublane/tile aligned batch axis
    Dp = ((D + 127) // 128) * 128
    if block_rows is None:
        tm = 256 if B >= 256 else ((B + 7) // 8) * 8
    else:
        tm = int(block_rows)
    assert tm % 8 == 0, "block_rows must be a multiple of 8"
    Bp = ((B + tm - 1) // tm) * tm

    def pad(x):
        return jnp.pad(x, ((0, Bp - B), (0, Dp - D)))

    img, txt = pad(image_features), pad(text_features)
    t_img, t_txt = pad(t_image_features), pad(t_text_features)

    scale_arr = jnp.asarray(logit_scale, jnp.float32).reshape(1, 1)
    cross_arr = jnp.asarray(cross_logit_scale, jnp.float32).reshape(1, 1)

    kernel = functools.partial(_kd_clip_kernel, B, D, tm, Bp, Dp, mxu_dtype)

    # rough VMEM budget: resident keys + normalized-text scratch +
    # double-buffered image tiles + logits working set
    esz = np.dtype(feat_dtype).itemsize
    vmem_est = (3 * Bp * Dp * esz + Bp * Dp * np.dtype(mxu_dtype).itemsize
                + 4 * tm * Dp * esz + 6 * tm * Bp * 4 + 4 * Bp * 4)
    vmem_limit = (int(min(vmem_est * 2, 112 * 2 ** 20))
                  if vmem_est > 24 * 2 ** 20 else None)

    smem_scalar = pl.BlockSpec((1, 1), lambda i: (0, 0),
                               memory_space=pltpu.MemorySpace.SMEM)
    row_tile = pl.BlockSpec((tm, Dp), lambda i: (i, 0))
    resident = pl.BlockSpec((Bp, Dp), lambda i: (0, 0))
    out_scalar = pl.BlockSpec((1, 1), lambda i: (0, 0),
                              memory_space=pltpu.MemorySpace.SMEM)
    scalar_shape = jax.ShapeDtypeStruct((1, 1), jnp.float32)

    grid_spec = pltpu.PrefetchScalarGridSpec(
        num_scalar_prefetch=0,
        grid=(Bp // tm,),
        in_specs=[smem_scalar, smem_scalar, row_tile, resident, resident, resident],
        out_specs=(out_scalar, out_scalar, out_scalar),
        scratch_shapes=[
            pltpu.VMEM((Bp, Dp), mxu_dtype),   # normalized text (resident keys)
            pltpu.VMEM((1, Bp), jnp.float32),  # online column max
            pltpu.VMEM((1, Bp), jnp.float32),  # online column sum-exp
            pltpu.SMEM((8,), jnp.float32),     # scalar loss accumulators
        ])

    task, fd, icl = pl.pallas_call(
        kernel,
        out_shape=(scalar_shape, scalar_shape, scalar_shape),
        grid_spec=grid_spec,
        # Row axis carries the online column-lse + scalar accumulators -> "arbitrary".
        compiler_params=pltpu.CompilerParams(
            dimension_semantics=("arbitrary",),
            vmem_limit_bytes=vmem_limit),
    )(scale_arr, cross_arr, img, txt, t_img, t_txt)

    return task[0, 0], fd[0, 0], icl[0, 0]


# ----------------------------- testing ------------------------------------


def _reference_f64(img, txt, logit_scale, t_img, t_txt, cross_scale):
    img = np.asarray(img).astype(np.float64)
    txt = np.asarray(txt).astype(np.float64)
    t_img = np.asarray(t_img).astype(np.float64)
    t_txt = np.asarray(t_txt).astype(np.float64)
    nimg = img / np.maximum(np.linalg.norm(img, axis=1, keepdims=True), 1e-12)
    ntxt = txt / np.maximum(np.linalg.norm(txt, axis=1, keepdims=True), 1e-12)

    def ce(logits):
        m = logits.max(axis=1, keepdims=True)
        lse = np.log(np.exp(logits - m).sum(axis=1)) + m[:, 0]
        return float(np.mean(lse - np.diag(logits)))

    li = float(logit_scale) * nimg @ ntxt.T
    task = 0.5 * (ce(li) + ce(li.T))
    fd = float(np.mean((nimg - t_img) ** 2) + np.mean((ntxt - t_txt) ** 2))
    icl = 0.5 * (ce(float(cross_scale) * nimg @ t_txt.T) +
                 ce(float(cross_scale) * ntxt @ t_img.T))
    return task, fd, icl


def _make_inputs(key, B, D, dtype):
    k1, k2, k3, k4 = jax.random.split(key, 4)
    img = jax.random.normal(k1, (B, D), jnp.float32)
    txt = jax.random.normal(k2, (B, D), jnp.float32)
    t_img = jax.random.normal(k3, (B, D), jnp.float32)
    t_img = t_img / jnp.linalg.norm(t_img, axis=1, keepdims=True)
    t_txt = jax.random.normal(k4, (B, D), jnp.float32)
    t_txt = t_txt / jnp.linalg.norm(t_txt, axis=1, keepdims=True)
    return (img.astype(dtype), txt.astype(dtype),
            t_img.astype(dtype), t_txt.astype(dtype))


def _check_case(key, B, D, dtype, block_rows, rtol, atol, name):
    img, txt, t_img, t_txt = _make_inputs(key, B, D, dtype)
    logit_scale = jnp.float32(1.0 / 0.07)            # exp(log(1/0.07)) passed to forward
    cross_scale = jnp.float32(np.log(1.0 / 0.07))    # raw parameter value
    outs = kd_clip_loss(img, txt, logit_scale, t_img, t_txt, cross_scale,
                        block_rows=block_rows)
    outs = jax.block_until_ready(outs)
    refs = _reference_f64(img, txt, logit_scale, t_img, t_txt, cross_scale)
    for o, r, lbl in zip(outs, refs, ("task", "fd", "icl")):
        np.testing.assert_allclose(np.asarray(o), np.asarray(r),
                                   rtol=rtol, atol=atol,
                                   err_msg=f"{name}:{lbl}")
    return outs


if __name__ == "__main__":
    key = jax.random.PRNGKey(0)
    k1, k2, k3, k4 = jax.random.split(key, 4)

    # 1) f32, single tile, lane-padded feature dim (D=64 -> 128)
    _check_case(k1, B=8, D=64, dtype=jnp.float32, block_rows=None,
                rtol=2e-2, atol=2e-2, name="f32_single_tile")

    # 2) f32, two row tiles with batch+feature padding and -inf masking,
    #    exercises the online column logsumexp merge
    _check_case(k2, B=12, D=40, dtype=jnp.float32, block_rows=8,
                rtol=2e-2, atol=2e-2, name="f32_padded_two_tiles")

    # 3) tiling self-consistency (precision-independent): single tile vs two
    #    row tiles on identical data must agree tightly
    img, txt, t_img, t_txt = _make_inputs(k3, 16, 64, jnp.float32)
    ls = jnp.float32(1.0 / 0.07)
    cs = jnp.float32(np.log(1.0 / 0.07))
    a = jax.block_until_ready(kd_clip_loss(img, txt, ls, t_img, t_txt, cs, block_rows=16))
    b = jax.block_until_ready(kd_clip_loss(img, txt, ls, t_img, t_txt, cs, block_rows=8))
    for x, y, lbl in zip(a, b, ("task", "fd", "icl")):
        np.testing.assert_allclose(np.asarray(x), np.asarray(y),
                                   rtol=1e-4, atol=1e-4,
                                   err_msg=f"tile_consistency:{lbl}")

    # 4) native bf16 DMA + bf16 MXU operands (f32 accumulation)
    _check_case(k4, B=16, D=64, dtype=jnp.bfloat16, block_rows=None,
                rtol=1e-1, atol=1e-1, name="bf16")

    print("KERNEL_OK")
</pallas_src>

<mosaic_0001>
module attributes {stable_mosaic.version = 11 : i64} {
  func.func @_kd_clip_kernel(%arg0: i32, %arg1: memref<1x1xf32, #tpu.memory_space<smem>>, %arg2: memref<1x1xf32, #tpu.memory_space<smem>>, %arg3: memref<8x128xf32, #tpu.memory_space<vmem>>, %arg4: memref<8x128xf32, #tpu.memory_space<vmem>>, %arg5: memref<8x128xf32, #tpu.memory_space<vmem>>, %arg6: memref<8x128xf32, #tpu.memory_space<vmem>>, %arg7: memref<1x1xf32, #tpu.memory_space<smem>>, %arg8: memref<1x1xf32, #tpu.memory_space<smem>>, %arg9: memref<1x1xf32, #tpu.memory_space<smem>>, %arg10: memref<8x128xf32, #tpu.memory_space<vmem>>, %arg11: memref<1x8xf32, #tpu.memory_space<vmem>>, %arg12: memref<1x8xf32, #tpu.memory_space<vmem>>, %arg13: memref<8xf32, #tpu.memory_space<smem>>) attributes {dimension_semantics = [#tpu.dimension_semantics<arbitrary>], iteration_bounds = array<i64: 1>, scalar_prefetch = 0 : i64, scratch_operands = 4 : i64, tpu.core_type = #tpu.core_type<tc>, window_params = [{transform_indices = @transform_0, window_bounds = array<i64: 1, 1>}, {transform_indices = @transform_1, window_bounds = array<i64: 1, 1>}, {transform_indices = @transform_2, window_bounds = array<i64: 8, 128>}, {pipeline_mode = #tpu.pipeline_mode<synchronous>, transform_indices = @transform_3, window_bounds = array<i64: 8, 128>}, {pipeline_mode = #tpu.pipeline_mode<synchronous>, transform_indices = @transform_4, window_bounds = array<i64: 8, 128>}, {pipeline_mode = #tpu.pipeline_mode<synchronous>, transform_indices = @transform_5, window_bounds = array<i64: 8, 128>}, {transform_indices = @transform_6, window_bounds = array<i64: 1, 1>}, {transform_indices = @transform_7, window_bounds = array<i64: 1, 1>}, {transform_indices = @transform_8, window_bounds = array<i64: 1, 1>}]} {
    %c8_i32 = arith.constant 8 : i32
    %0 = arith.muli %arg0, %c8_i32 : i32
    %1 = tpu.assume_multiple %0, 8 : i32
    %c0 = arith.constant 0 : index
    %c0_0 = arith.constant 0 : index
    %2 = memref.load %arg1[%c0, %c0_0] : memref<1x1xf32, #tpu.memory_space<smem>>
    %c0_1 = arith.constant 0 : index
    %c0_2 = arith.constant 0 : index
    %3 = memref.load %arg2[%c0_1, %c0_2] : memref<1x1xf32, #tpu.memory_space<smem>>
    %c0_i32 = arith.constant 0 : i32
    %4 = arith.cmpi eq, %arg0, %c0_i32 : i32
    %5 = arith.extui %4 : i1 to i32
    %c0_i32_3 = arith.constant 0 : i32
    %6 = arith.cmpi ne, %5, %c0_i32_3 : i32
    scf.if %6 {
      %c0_54 = arith.constant 0 : index
      %c0_55 = arith.constant 0 : index
      %137 = vector.load %arg4[%c0_54, %c0_55] : memref<8x128xf32, #tpu.memory_space<vmem>>, vector<8x128xf32>
      %138 = arith.mulf %137, %137 : vector<8x128xf32>
      %cst_56 = arith.constant dense<0.000000e+00> : vector<8xf32>
      %139 = vector.multi_reduction <add>, %138, %cst_56 [1] : vector<8x128xf32> to vector<8xf32>
      %140 = vector.shape_cast %139 : vector<8xf32> to vector<8x1xf32>
      %cst_57 = arith.constant 1.000000e-24 : f32
      %141 = vector.broadcast %cst_57 : f32 to vector<8x1xf32>
      %142 = arith.maximumf %140, %141 : vector<8x1xf32>
      %143 = math.rsqrt %142 : vector<8x1xf32>
      %144 = vector.broadcast %143 : vector<8x1xf32> to vector<8x128xf32>
      %145 = arith.mulf %137, %144 : vector<8x128xf32>
      %c0_58 = arith.constant 0 : index
      %c0_59 = arith.constant 0 : index
      %146 = vector.load %arg10[%c0_58, %c0_59] : memref<8x128xf32, #tpu.memory_space<vmem>>, vector<8x128xf32>
      tpu.vector_store %arg10[%c0_58, %c0_59], %145 {strides = array<i32>} : memref<8x128xf32, #tpu.memory_space<vmem>>, vector<8x128xf32>,
      %cst_60 = arith.constant -1.000000e+30 : f32
      %147 = vector.broadcast %cst_60 : f32 to vector<1x8xf32>
      %c0_61 = arith.constant 0 : index
      %c0_62 = arith.constant 0 : index
      %148 = vector.load %arg11[%c0_61, %c0_62] : memref<1x8xf32, #tpu.memory_space<vmem>>, vector<1x8xf32>
      tpu.vector_store %arg11[%c0_61, %c0_62], %147 {strides = array<i32>} : memref<1x8xf32, #tpu.memory_space<vmem>>, vector<1x8xf32>,
      %cst_63 = arith.constant 0.000000e+00 : f32
      %149 = vector.broadcast %cst_63 : f32 to vector<1x8xf32>
      %c0_64 = arith.constant 0 : index
      %c0_65 = arith.constant 0 : index
      %150 = vector.load %arg12[%c0_64, %c0_65] : memref<1x8xf32, #tpu.memory_space<vmem>>, vector<1x8xf32>
      tpu.vector_store %arg12[%c0_64, %c0_65], %149 {strides = array<i32>} : memref<1x8xf32, #tpu.memory_space<vmem>>, vector<1x8xf32>,
      %cst_66 = arith.constant 0.000000e+00 : f32
      %c0_67 = arith.constant 0 : index
      %151 = memref.load %arg13[%c0_67] : memref<8xf32, #tpu.memory_space<smem>>
      memref.store %cst_66, %arg13[%c0_67] : memref<8xf32, #tpu.memory_space<smem>>
      %cst_68 = arith.constant 0.000000e+00 : f32
      %c1_69 = arith.constant 1 : index
      %152 = memref.load %arg13[%c1_69] : memref<8xf32, #tpu.memory_space<smem>>
      memref.store %cst_68, %arg13[%c1_69] : memref<8xf32, #tpu.memory_space<smem>>
      %cst_70 = arith.constant 0.000000e+00 : f32
      %c2_71 = arith.constant 2 : index
      %153 = memref.load %arg13[%c2_71] : memref<8xf32, #tpu.memory_space<smem>>
      memref.store %cst_70, %arg13[%c2_71] : memref<8xf32, #tpu.memory_space<smem>>
      %cst_72 = arith.constant 0.000000e+00 : f32
      %c3_73 = arith.constant 3 : index
      %154 = memref.load %arg13[%c3_73] : memref<8xf32, #tpu.memory_space<smem>>
      memref.store %cst_72, %arg13[%c3_73] : memref<8xf32, #tpu.memory_space<smem>>
      %cst_74 = arith.constant 0.000000e+00 : f32
      %c4_75 = arith.constant 4 : index
      %155 = memref.load %arg13[%c4_75] : memref<8xf32, #tpu.memory_space<smem>>
      memref.store %cst_74, %arg13[%c4_75] : memref<8xf32, #tpu.memory_space<smem>>
    } else {
    }
    %c0_4 = arith.constant 0 : index
    %c0_5 = arith.constant 0 : index
    %7 = vector.load %arg3[%c0_4, %c0_5] : memref<8x128xf32, #tpu.memory_space<vmem>>, vector<8x128xf32>
    %8 = arith.mulf %7, %7 : vector<8x128xf32>
    %cst = arith.constant dense<0.000000e+00> : vector<8xf32>
    %9 = vector.multi_reduction <add>, %8, %cst [1] : vector<8x128xf32> to vector<8xf32>
    %10 = vector.shape_cast %9 : vector<8xf32> to vector<8x1xf32>
    %cst_6 = arith.constant 1.000000e-24 : f32
    %11 = vector.broadcast %cst_6 : f32 to vector<8x1xf32>
    %12 = arith.maximumf %10, %11 : vector<8x1xf32>
    %13 = math.rsqrt %12 : vector<8x1xf32>
    %14 = vector.broadcast %13 : vector<8x1xf32> to vector<8x128xf32>
    %15 = arith.mulf %7, %14 : vector<8x128xf32>
    %16 = arith.index_cast %1 : i32 to index
    %c0_7 = arith.constant 0 : index
    %17 = vector.load %arg10[%16, %c0_7] : memref<8x128xf32, #tpu.memory_space<vmem>>, vector<8x128xf32>
    %18 = arith.index_cast %1 : i32 to index
    %c0_8 = arith.constant 0 : index
    %19 = vector.load %arg5[%18, %c0_8] : memref<8x128xf32, #tpu.memory_space<vmem>>, vector<8x128xf32>
    %20 = arith.index_cast %1 : i32 to index
    %c0_9 = arith.constant 0 : index
    %21 = vector.load %arg6[%20, %c0_9] : memref<8x128xf32, #tpu.memory_space<vmem>>, vector<8x128xf32>
    %22 = vector.broadcast %2 : f32 to vector<8x128xf32>
    %23 = arith.mulf %22, %15 : vector<8x128xf32>
    %c0_10 = arith.constant 0 : index
    %c0_11 = arith.constant 0 : index
    %24 = vector.load %arg10[%c0_10, %c0_11] : memref<8x128xf32, #tpu.memory_space<vmem>>, vector<8x128xf32>
    %cst_12 = arith.constant dense<0.000000e+00> : vector<8x8xf32>
    %25 = tpu.matmul %23, %24, %cst_12 {dimension_numbers = #tpu.dot_dimension_numbers<[1], [1], [0], [0], [0, 0, 1, 0], [], []>} : vector<8x128xf32>, vector<8x128xf32>, vector<8x8xf32> -> vector<8x8xf32>
    %26 = arith.mulf %23, %17 : vector<8x128xf32>
    %cst_13 = arith.constant dense<0.000000e+00> : vector<8xf32>
    %27 = vector.multi_reduction <add>, %26, %cst_13 [1] : vector<8x128xf32> to vector<8xf32>
    %28 = vector.shape_cast %27 : vector<8xf32> to vector<8x1xf32>
    %c0_14 = arith.constant 0 : index
    %29 = memref.load %arg13[%c0_14] : memref<8xf32, #tpu.memory_space<smem>>
    %cst_15 = arith.constant dense<0xFF800000> : vector<8xf32>
    %30 = vector.multi_reduction <maximumf>, %25, %cst_15 [1] : vector<8x8xf32> to vector<8xf32>
    %31 = vector.shape_cast %30 : vector<8xf32> to vector<8x1xf32>
    %32 = vector.broadcast %31 : vector<8x1xf32> to vector<8x8xf32>
    %33 = arith.subf %25, %32 : vector<8x8xf32>
    %34 = math.exp %33 : vector<8x8xf32>
    %cst_16 = arith.constant dense<0.000000e+00> : vector<8xf32>
    %35 = vector.multi_reduction <add>, %34, %cst_16 [1] : vector<8x8xf32> to vector<8xf32>
    %36 = vector.shape_cast %35 : vector<8xf32> to vector<8x1xf32>
    %37 = math.log %36 : vector<8x1xf32>
    %38 = arith.addf %37, %31 : vector<8x1xf32>
    %39 = arith.subf %38, %28 : vector<8x1xf32>
    %40 = vector.shape_cast %39 : vector<8x1xf32> to vector<1x8x1xf32>
    %cst_17 = arith.constant dense<0.000000e+00> : vector<1xf32>
    %41 = vector.multi_reduction <add>, %40, %cst_17 [1, 2] : vector<1x8x1xf32> to vector<1xf32>
    %42 = vector.shape_cast %41 : vector<1xf32> to vector<1x1x1xf32>
    %43 = vector.extract %42[0, 0, 0] : f32 from vector<1x1x1xf32>
    %44 = arith.addf %29, %43 : f32
    %c0_18 = arith.constant 0 : index
    %45 = memref.load %arg13[%c0_18] : memref<8xf32, #tpu.memory_space<smem>>
    memref.store %44, %arg13[%c0_18] : memref<8xf32, #tpu.memory_space<smem>>
    %c1 = arith.constant 1 : index
    %46 = memref.load %arg13[%c1] : memref<8xf32, #tpu.memory_space<smem>>
    %47 = vector.shape_cast %28 : vector<8x1xf32> to vector<1x8x1xf32>
    %cst_19 = arith.constant dense<0.000000e+00> : vector<1xf32>
    %48 = vector.multi_reduction <add>, %47, %cst_19 [1, 2] : vector<1x8x1xf32> to vector<1xf32>
    %49 = vector.shape_cast %48 : vector<1xf32> to vector<1x1x1xf32>
    %50 = vector.extract %49[0, 0, 0] : f32 from vector<1x1x1xf32>
    %51 = arith.addf %46, %50 : f32
    %c1_20 = arith.constant 1 : index
    %52 = memref.load %arg13[%c1_20] : memref<8xf32, #tpu.memory_space<smem>>
    memref.store %51, %arg13[%c1_20] : memref<8xf32, #tpu.memory_space<smem>>
    %cst_21 = arith.constant dense<0xFF800000> : vector<8xf32>
    %53 = vector.multi_reduction <maximumf>, %25, %cst_21 [0] : vector<8x8xf32> to vector<8xf32>
    %54 = vector.shape_cast %53 : vector<8xf32> to vector<1x8xf32>
    %c0_22 = arith.constant 0 : index
    %c0_23 = arith.constant 0 : index
    %55 = vector.load %arg11[%c0_22, %c0_23] : memref<1x8xf32, #tpu.memory_space<vmem>>, vector<1x8xf32>
    %56 = arith.maximumf %55, %54 : vector<1x8xf32>
    %57 = vector.broadcast %56 : vector<1x8xf32> to vector<8x8xf32>
    %58 = arith.subf %25, %57 : vector<8x8xf32>
    %59 = math.exp %58 : vector<8x8xf32>
    %cst_24 = arith.constant dense<0.000000e+00> : vector<8xf32>
    %60 = vector.multi_reduction <add>, %59, %cst_24 [0] : vector<8x8xf32> to vector<8xf32>
    %61 = vector.shape_cast %60 : vector<8xf32> to vector<1x8xf32>
    %c0_25 = arith.constant 0 : index
    %c0_26 = arith.constant 0 : index
    %62 = vector.load %arg12[%c0_25, %c0_26] : memref<1x8xf32, #tpu.memory_space<vmem>>, vector<1x8xf32>
    %c0_27 = arith.constant 0 : index
    %c0_28 = arith.constant 0 : index
    %63 = vector.load %arg11[%c0_27, %c0_28] : memref<1x8xf32, #tpu.memory_space<vmem>>, vector<1x8xf32>
    %64 = arith.subf %63, %56 : vector<1x8xf32>
    %65 = math.exp %64 : vector<1x8xf32>
    %66 = arith.mulf %62, %65 : vector<1x8xf32>
    %67 = arith.addf %66, %61 : vector<1x8xf32>
    %c0_29 = arith.constant 0 : index
    %c0_30 = arith.constant 0 : index
    %68 = vector.load %arg12[%c0_29, %c0_30] : memref<1x8xf32, #tpu.memory_space<vmem>>, vector<1x8xf32>
    tpu.vector_store %arg12[%c0_29, %c0_30], %67 {strides = array<i32>} : memref<1x8xf32, #tpu.memory_space<vmem>>, vector<1x8xf32>,
    %c0_31 = arith.constant 0 : index
    %c0_32 = arith.constant 0 : index
    %69 = vector.load %arg11[%c0_31, %c0_32] : memref<1x8xf32, #tpu.memory_space<vmem>>, vector<1x8xf32>
    tpu.vector_store %arg11[%c0_31, %c0_32], %56 {strides = array<i32>} : memref<1x8xf32, #tpu.memory_space<vmem>>, vector<1x8xf32>,
    %70 = vector.broadcast %3 : f32 to vector<8x128xf32>
    %71 = arith.mulf %70, %15 : vector<8x128xf32>
    %c0_33 = arith.constant 0 : index
    %c0_34 = arith.constant 0 : index
    %72 = vector.load %arg6[%c0_33, %c0_34] : memref<8x128xf32, #tpu.memory_space<vmem>>, vector<8x128xf32>
    %cst_35 = arith.constant dense<0.000000e+00> : vector<8x8xf32>
    %73 = tpu.matmul %71, %72, %cst_35 {dimension_numbers = #tpu.dot_dimension_numbers<[1], [1], [0], [0], [0, 0, 1, 0], [], []>} : vector<8x128xf32>, vector<8x128xf32>, vector<8x8xf32> -> vector<8x8xf32>
    %74 = arith.mulf %71, %21 : vector<8x128xf32>
    %cst_36 = arith.constant dense<0.000000e+00> : vector<8xf32>
    %75 = vector.multi_reduction <add>, %74, %cst_36 [1] : vector<8x128xf32> to vector<8xf32>
    %76 = vector.shape_cast %75 : vector<8xf32> to vector<8x1xf32>
    %c2 = arith.constant 2 : index
    %77 = memref.load %arg13[%c2] : memref<8xf32, #tpu.memory_space<smem>>
    %cst_37 = arith.constant dense<0xFF800000> : vector<8xf32>
    %78 = vector.multi_reduction <maximumf>, %73, %cst_37 [1] : vector<8x8xf32> to vector<8xf32>
    %79 = vector.shape_cast %78 : vector<8xf32> to vector<8x1xf32>
    %80 = vector.broadcast %79 : vector<8x1xf32> to vector<8x8xf32>
    %81 = arith.subf %73, %80 : vector<8x8xf32>
    %82 = math.exp %81 : vector<8x8xf32>
    %cst_38 = arith.constant dense<0.000000e+00> : vector<8xf32>
    %83 = vector.multi_reduction <add>, %82, %cst_38 [1] : vector<8x8xf32> to vector<8xf32>
    %84 = vector.shape_cast %83 : vector<8xf32> to vector<8x1xf32>
    %85 = math.log %84 : vector<8x1xf32>
    %86 = arith.addf %85, %79 : vector<8x1xf32>
    %87 = arith.subf %86, %76 : vector<8x1xf32>
    %88 = vector.shape_cast %87 : vector<8x1xf32> to vector<1x8x1xf32>
    %cst_39 = arith.constant dense<0.000000e+00> : vector<1xf32>
    %89 = vector.multi_reduction <add>, %88, %cst_39 [1, 2] : vector<1x8x1xf32> to vector<1xf32>
    %90 = vector.shape_cast %89 : vector<1xf32> to vector<1x1x1xf32>
    %91 = vector.extract %90[0, 0, 0] : f32 from vector<1x1x1xf32>
    %92 = arith.addf %77, %91 : f32
    %c2_40 = arith.constant 2 : index
    %93 = memref.load %arg13[%c2_40] : memref<8xf32, #tpu.memory_space<smem>>
    memref.store %92, %arg13[%c2_40] : memref<8xf32, #tpu.memory_space<smem>>
    %94 = vector.broadcast %3 : f32 to vector<8x128xf32>
    %95 = arith.mulf %94, %17 : vector<8x128xf32>
    %c0_41 = arith.constant 0 : index
    %c0_42 = arith.constant 0 : index
    %96 = vector.load %arg5[%c0_41, %c0_42] : memref<8x128xf32, #tpu.memory_space<vmem>>, vector<8x128xf32>
    %cst_43 = arith.constant dense<0.000000e+00> : vector<8x8xf32>
    %97 = tpu.matmul %95, %96, %cst_43 {dimension_numbers = #tpu.dot_dimension_numbers<[1], [1], [0], [0], [0, 0, 1, 0], [], []>} : vector<8x128xf32>, vector<8x128xf32>, vector<8x8xf32> -> vector<8x8xf32>
    %98 = arith.mulf %95, %19 : vector<8x128xf32>
    %cst_44 = arith.constant dense<0.000000e+00> : vector<8xf32>
    %99 = vector.multi_reduction <add>, %98, %cst_44 [1] : vector<8x128xf32> to vector<8xf32>
    %100 = vector.shape_cast %99 : vector<8xf32> to vector<8x1xf32>
    %c3 = arith.constant 3 : index
    %101 = memref.load %arg13[%c3] : memref<8xf32, #tpu.memory_space<smem>>
    %cst_45 = arith.constant dense<0xFF800000> : vector<8xf32>
    %102 = vector.multi_reduction <maximumf>, %97, %cst_45 [1] : vector<8x8xf32> to vector<8xf32>
    %103 = vector.shape_cast %102 : vector<8xf32> to vector<8x1xf32>
    %104 = vector.broadcast %103 : vector<8x1xf32> to vector<8x8xf32>
    %105 = arith.subf %97, %104 : vector<8x8xf32>
    %106 = math.exp %105 : vector<8x8xf32>
    %cst_46 = arith.constant dense<0.000000e+00> : vector<8xf32>
    %107 = vector.multi_reduction <add>, %106, %cst_46 [1] : vector<8x8xf32> to vector<8xf32>
    %108 = vector.shape_cast %107 : vector<8xf32> to vector<8x1xf32>
    %109 = math.log %108 : vector<8x1xf32>
    %110 = arith.addf %109, %103 : vector<8x1xf32>
    %111 = arith.subf %110, %100 : vector<8x1xf32>
    %112 = vector.shape_cast %111 : vector<8x1xf32> to vector<1x8x1xf32>
    %cst_47 = arith.constant dense<0.000000e+00> : vector<1xf32>
    %113 = vector.multi_reduction <add>, %112, %cst_47 [1, 2] : vector<1x8x1xf32> to vector<1xf32>
    %114 = vector.shape_cast %113 : vector<1xf32> to vector<1x1x1xf32>
    %115 = vector.extract %114[0, 0, 0] : f32 from vector<1x1x1xf32>
    %116 = arith.addf %101, %115 : f32
    %c3_48 = arith.constant 3 : index
    %117 = memref.load %arg13[%c3_48] : memref<8xf32, #tpu.memory_space<smem>>
    memref.store %116, %arg13[%c3_48] : memref<8xf32, #tpu.memory_space<smem>>
    %118 = arith.subf %15, %19 : vector<8x128xf32>
    %119 = arith.subf %17, %21 : vector<8x128xf32>
    %c4 = arith.constant 4 : index
    %120 = memref.load %arg13[%c4] : memref<8xf32, #tpu.memory_space<smem>>
    %121 = arith.mulf %118, %118 : vector<8x128xf32>
    %122 = vector.shape_cast %121 : vector<8x128xf32> to vector<1x8x128xf32>
    %cst_49 = arith.constant dense<0.000000e+00> : vector<1xf32>
    %123 = vector.multi_reduction <add>, %122, %cst_49 [1, 2] : vector<1x8x128xf32> to vector<1xf32>
    %124 = vector.shape_cast %123 : vector<1xf32> to vector<1x1x1xf32>
    %125 = vector.extract %124[0, 0, 0] : f32 from vector<1x1x1xf32>
    %126 = arith.addf %120, %125 : f32
    %127 = arith.mulf %119, %119 : vector<8x128xf32>
    %128 = vector.shape_cast %127 : vector<8x128xf32> to vector<1x8x128xf32>
    %cst_50 = arith.constant dense<0.000000e+00> : vector<1xf32>
    %129 = vector.multi_reduction <add>, %128, %cst_50 [1, 2] : vector<1x8x128xf32> to vector<1xf32>
    %130 = vector.shape_cast %129 : vector<1xf32> to vector<1x1x1xf32>
    %131 = vector.extract %130[0, 0, 0] : f32 from vector<1x1x1xf32>
    %132 = arith.addf %126, %131 : f32
    %c4_51 = arith.constant 4 : index
    %133 = memref.load %arg13[%c4_51] : memref<8xf32, #tpu.memory_space<smem>>
    memref.store %132, %arg13[%c4_51] : memref<8xf32, #tpu.memory_space<smem>>
    %c0_i32_52 = arith.constant 0 : i32
    %134 = arith.cmpi eq, %arg0, %c0_i32_52 : i32
    %135 = arith.extui %134 : i1 to i32
    %c0_i32_53 = arith.constant 0 : i32
    %136 = arith.cmpi ne, %135, %c0_i32_53 : i32
    scf.if %136 {
      %c0_54 = arith.constant 0 : index
      %c0_55 = arith.constant 0 : index
      %137 = vector.load %arg12[%c0_54, %c0_55] : memref<1x8xf32, #tpu.memory_space<vmem>>, vector<1x8xf32>
      %138 = math.log %137 : vector<1x8xf32>
      %c0_56 = arith.constant 0 : index
      %c0_57 = arith.constant 0 : index
      %139 = vector.load %arg11[%c0_56, %c0_57] : memref<1x8xf32, #tpu.memory_space<vmem>>, vector<1x8xf32>
      %140 = arith.addf %138, %139 : vector<1x8xf32>
      %141 = vector.shape_cast %140 : vector<1x8xf32> to vector<1x1x8xf32>
      %cst_58 = arith.constant dense<0.000000e+00> : vector<1xf32>
      %142 = vector.multi_reduction <add>, %141, %cst_58 [1, 2] : vector<1x1x8xf32> to vector<1xf32>
      %143 = vector.shape_cast %142 : vector<1xf32> to vector<1x1x1xf32>
      %144 = vector.extract %143[0, 0, 0] : f32 from vector<1x1x1xf32>
      %c0_59 = arith.constant 0 : index
      %145 = memref.load %arg13[%c0_59] : memref<8xf32, #tpu.memory_space<smem>>
      %cst_60 = arith.constant 1.250000e-01 : f32
      %146 = arith.mulf %145, %cst_60 : f32
      %c1_61 = arith.constant 1 : index
      %147 = memref.load %arg13[%c1_61] : memref<8xf32, #tpu.memory_space<smem>>
      %148 = arith.subf %144, %147 : f32
      %cst_62 = arith.constant 1.250000e-01 : f32
      %149 = arith.mulf %148, %cst_62 : f32
      %150 = arith.addf %146, %149 : f32
      %cst_63 = arith.constant 5.000000e-01 : f32
      %151 = arith.mulf %cst_63, %150 : f32
      %c0_64 = arith.constant 0 : index
      %c0_65 = arith.constant 0 : index
      %152 = memref.load %arg7[%c0_64, %c0_65] : memref<1x1xf32, #tpu.memory_space<smem>>
      memref.store %151, %arg7[%c0_64, %c0_65] : memref<1x1xf32, #tpu.memory_space<smem>>
      %c4_66 = arith.constant 4 : index
      %153 = memref.load %arg13[%c4_66] : memref<8xf32, #tpu.memory_space<smem>>
      %cst_67 = arith.constant 0.001953125 : f32
      %154 = arith.mulf %153, %cst_67 : f32
      %c0_68 = arith.constant 0 : index
      %c0_69 = arith.constant 0 : index
      %155 = memref.load %arg8[%c0_68, %c0_69] : memref<1x1xf32, #tpu.memory_space<smem>>
      memref.store %154, %arg8[%c0_68, %c0_69] : memref<1x1xf32, #tpu.memory_space<smem>>
      %c2_70 = arith.constant 2 : index
      %156 = memref.load %arg13[%c2_70] : memref<8xf32, #tpu.memory_space<smem>>
      %c3_71 = arith.constant 3 : index
      %157 = memref.load %arg13[%c3_71] : memref<8xf32, #tpu.memory_space<smem>>
      %158 = arith.addf %156, %157 : f32
      %cst_72 = arith.constant 5.000000e-01 : f32
      %159 = arith.mulf %cst_72, %158 : f32
      %cst_73 = arith.constant 1.250000e-01 : f32
      %160 = arith.mulf %159, %cst_73 : f32
      %c0_74 = arith.constant 0 : index
      %c0_75 = arith.constant 0 : index
      %161 = memref.load %arg9[%c0_74, %c0_75] : memref<1x1xf32, #tpu.memory_space<smem>>
      memref.store %160, %arg9[%c0_74, %c0_75] : memref<1x1xf32, #tpu.memory_space<smem>>
    } else {
    }
    return
  }
  func.func @transform_0(%arg0: i32) -> (i32, i32) {
    %c0_i32 = arith.constant 0 : i32
    %c0_i32_0 = arith.constant 0 : i32
    %c0_i32_1 = arith.constant 0 : i32
    return %c0_i32, %c0_i32_0 : i32, i32
  }
  func.func @transform_1(%arg0: i32) -> (i32, i32) {
    %c0_i32 = arith.constant 0 : i32
    %c0_i32_0 = arith.constant 0 : i32
    %c0_i32_1 = arith.constant 0 : i32
    return %c0_i32, %c0_i32_0 : i32, i32
  }
  func.func @transform_2(%arg0: i32) -> (i32, i32) {
    %c0_i32 = arith.constant 0 : i32
    %c0_i32_0 = arith.constant 0 : i32
    return %arg0, %c0_i32 : i32, i32
  }
  func.func @transform_3(%arg0: i32) -> (i32, i32) {
    %c0_i32 = arith.constant 0 : i32
    %c0_i32_0 = arith.constant 0 : i32
    %c0_i32_1 = arith.constant 0 : i32
    return %c0_i32, %c0_i32_0 : i32, i32
  }
  func.func @transform_4(%arg0: i32) -> (i32, i32) {
    %c0_i32 = arith.constant 0 : i32
    %c0_i32_0 = arith.constant 0 : i32
    %c0_i32_1 = arith.constant 0 : i32
    return %c0_i32, %c0_i32_0 : i32, i32
  }
  func.func @transform_5(%arg0: i32) -> (i32, i32) {
    %c0_i32 = arith.constant 0 : i32
    %c0_i32_0 = arith.constant 0 : i32
    %c0_i32_1 = arith.constant 0 : i32
    return %c0_i32, %c0_i32_0 : i32, i32
  }
  func.func @transform_6(%arg0: i32) -> (i32, i32) {
    %c0_i32 = arith.constant 0 : i32
    %c0_i32_0 = arith.constant 0 : i32
    %c0_i32_1 = arith.constant 0 : i32
    return %c0_i32, %c0_i32_0 : i32, i32
  }
  func.func @transform_7(%arg0: i32) -> (i32, i32) {
    %c0_i32 = arith.constant 0 : i32
    %c0_i32_0 = arith.constant 0 : i32
    %c0_i32_1 = arith.constant 0 : i32
    return %c0_i32, %c0_i32_0 : i32, i32
  }
  func.func @transform_8(%arg0: i32) -> (i32, i32) {
    %c0_i32 = arith.constant 0 : i32
    %c0_i32_0 = arith.constant 0 : i32
    %c0_i32_1 = arith.constant 0 : i32
    return %c0_i32, %c0_i32_0 : i32, i32
  }
}

</mosaic_0001>

<bundles_post_ra>
// kernel: tpu_custom_call.1
= control target key start
LH: loop header
LB: loop body
LE: loop exit
PB: predicated region body
PF: predicated region fallthrough
CT: control target
= control target key end

     0   :  { %16 = vsyncpa [#allocation9], 0  ;;  %s879_s0 = inlined_call_operand.<no memory space> [shape: f32[1,1], index: 0, kind: input, shape index: {}]   ;;  %s880_s1 = inlined_call_operand.<no memory space> [shape: f32[1,1], index: 1, kind: input, shape index: {}]   ;;  %s881_s2 = inlined_call_operand.hbm [shape: f32[8,128], index: 2, kind: input, shape index: {}]   ;;  %s882_s3 = inlined_call_operand.vmem [shape: f32[8,128], index: 3, kind: input, shape index: {}]   ;;  %s883_s4 = inlined_call_operand.hbm [shape: f32[8,128], index: 4, kind: input, shape index: {}]   ;;  %s884_s5 = inlined_call_operand.vmem [shape: f32[8,128], index: 5, kind: input, shape index: {}]   ;;  %s885_s6 = inlined_call_operand.hbm [shape: f32[1,1], index: 6, kind: output, shape index: {0}]   ;;  %s886_s7 = inlined_call_operand.hbm [shape: f32[1,1], index: 7, kind: output, shape index: {1}]   ;;  %s887_s8 = inlined_call_operand.hbm [shape: f32[1,1], index: 8, kind: output, shape index: {2}]  }
   0x1   :  { %17 = vsyncpa [#allocation12], 0 }
   0x2   :  { %18 = vsyncpa [#allocation10], 0 }
   0x3   :  { %19 = vsyncpa [#allocation15], 0  ;;  %s710_s27 = smov [#allocation8]   ;;  %s711_s29 = smov [#allocation11]  }
   0x4   :  { %s30_s28 = sshll.u32 %s710_s27, 4  ;;  %s42_s30 = sshll.u32 %s711_s29, 4  ;;  %s31_s28 = int_to_ptr.vmem [resolvable:$true] %s30_s28  ;;  %s43_s30 = int_to_ptr.vmem [resolvable:$true] %s42_s30 }
   0x5   :  { %s628_s11 = scalar_lea.hbm %s881_s2, 128 }
   0x6   :  { %p629_p0 = scmp.ne.s32.totalorder %s881_s2, %s628_s11  ;;  %p632_p1 = scmp.lt.u32.totalorder %s628_s11, %s881_s2 }
   0x8   :  { %p634_p2 = pnand %p632_p1, %p629_p0 }
   0xa   :  { %637 = shalt.err (!%p634_p2)
}
   0xb   :  { %s638_s16 = scalar_lea.vmem %s31_s28, 128  ;;  %p643_p4 = scmp.lt.s32.totalorder %s31_s28, %s31_s28 }
   0xc   :  { %p639_p3 = scmp.ne.s32.totalorder %s31_s28, %s638_s16  ;;  %p644_p5 = scmp.lt.s32.totalorder %s638_s16, %s638_s16 }
   0xe   :  { %p645_p6 = por %p644_p5, %p643_p4 }
  0x10   :  { %p646_p7 = pnand %p645_p6, %p639_p3 }
  0x12   :  { %649 = shalt.err (!%p646_p7)
}
  0x13   :  { %33 = dma.hbm_to_vmem [thread:$0]  %s881_s2, 128, %s31_s28, [#allocation9]  }
  0x14   :  { %s650_s21 = scalar_lea.hbm %s883_s4, 128 }
  0x15   :  { %p651_p8 = scmp.ne.s32.totalorder %s883_s4, %s650_s21  ;;  %p654_p9 = scmp.lt.u32.totalorder %s650_s21, %s883_s4 }
  0x17   :  { %p656_p10 = pnand %p654_p9, %p651_p8 }
  0x19   :  { %659 = shalt.err (!%p656_p10)
}
  0x1a   :  { %s660_s26 = scalar_lea.vmem %s43_s30, 128  ;;  %p665_p12 = scmp.lt.s32.totalorder %s43_s30, %s43_s30 }
  0x1b   :  { %p661_p11 = scmp.ne.s32.totalorder %s43_s30, %s660_s26  ;;  %p666_p13 = scmp.lt.s32.totalorder %s660_s26, %s660_s26 }
  0x1d   :  { %p667_p0 = por %p666_p13, %p665_p12 }
  0x1f   :  { %p668_p1 = pnand %p667_p0, %p661_p11 }
  0x21   :  { %671 = shalt.err (!%p668_p1)
}
  0x22   :  { %45 = dma.hbm_to_vmem [thread:$0]  %s883_s4, 128, %s43_s30, [#allocation12]  }
  0x23   :  { %702 = dma.done.wait [#allocation9], 128  }
  0x24   :  { %703 = vsyncadd [#allocation9], 4294967168 }
  0x25   :  { %704 = dma.done.wait [#allocation12], 128  }
  0x26   :  { %705 = vsyncadd [#allocation12], 4294967168  ;;  %v61_v0 = vld [vmem:[%s882_s3] sm:$0xff]  ;;  %v712_v4 = vmov 0.0   ;;  %vm713_vm0 = vmmov 0   ;;  %v247_v11 = vstv %s880_s1  ;;  %v351_v13 = vld [vmem:[#allocation11] sm:$0xff]  ;;  %v95_v16 = vstv %s879_s0 }
  0x27   :  { %v82_v1 = vld [vmem:[#allocation8] sm:$0xff]  ;;  %v62_v2 = vmul.f32 %v61_v0, %v61_v0  ;;  %569 = vmatprep.subr.mxu0 %v712_v4  ;;  %574 = vmatprep.subr.mxu1 %v712_v4  ;;  %vm69_vm1 = vcmask 57344   ;;  %v714_v23 = vmov -1e+30   ;;  %vm172_vm2 = vcmask 64512   ;;  %s672_s2 = scalar_lea.hbm %s886_s7, 16 }
  0x28   :  { %v83_v3 = vmul.f32 %v82_v1, %v82_v1  ;;  %v793_v5 = vld [vmem:[%s884_s5] sm:$0xff]  ;;  %571 = vmatprep.mubr.msk.f32.mxu0 %vm713_vm0, %v712_v4  ;;  %576 = vmatprep.mubr.msk.f32.mxu1 %vm713_vm0, %v712_v4  ;;  %70 = vst.msk [vmem:[#allocation3] sm:$0x1] %vm69_vm1, %v714_v23  ;;  %71 = vst.msk [vmem:[#allocation4] sm:$0x1] %vm69_vm1, %v712_v4  ;;  %v223_v30 = vlaneseq  ;;  %vm186_vm3 = vcmask 7168   ;;  %p673_p2 = scmp.ne.s32.totalorder %s886_s7, %s672_s2  ;;  %p676_p3 = scmp.lt.u32.totalorder %s672_s2, %s886_s7 }
  0x29   :  { %63 = vadd.xlane.f32.xlu0 %v62_v2  ;;  %575 = vmatpush3.xpose.msra.mxu1 %v793_v5 }
  0x2a   :  { %v224_v37 = vshrl.u32 %v223_v30, 7  ;;  %p678_p4 = pnand %p676_p3, %p673_p2 }
  0x2c   :  { %v225_v41 = vsub.s32 0, %v224_v37 }
  0x2d   :  { %84 = vadd.xlane.f32.xlu0 %v83_v3 }
  0x2f   :  { %v220_v40 = vld [vmem:[#allocation3] sm:$0x1]  ;;  %v238_v56 = vld [vmem:[#allocation4] sm:$0x1] }
  0xb6   :  { %v64_v6 = vpop.xlane.xlu0 %63 }
  0xb7   :  { %v65_v7 = vmax.f32 %v64_v6, 1e-24 }
  0xb9   :  { %606 = vrsqrt.f32 %v65_v7 }
  0xba   :  { %v85_v8 = vpop.xlane.xlu0 %84 }
  0xbb   :  { %v86_v9 = vmax.f32 %v85_v8, 1e-24 }
  0xbd   :  { %608 = vrsqrt.f32 %v86_v9 }
  0xc3   :  { %v607_v10 = vpop.eup %606 }
  0xc4   :  { %v801_v12 = vmul.f32 %v607_v10, %v61_v0 }
  0xc6   :  { %570 = vmatpush3.xpose.msra.mxu0 %v801_v12  ;;  %v350_v14 = vmul.f32 %v247_v11, %v801_v12 }
  0xc7   :  { %v609_v15 = vpop.eup %608  ;;  %579 = vmatprep.subr.mxu0 %v712_v4 }
  0xc8   :  { %v88_v17 = vmul.f32 %v609_v15, %v82_v1  ;;  %v808_v18 = vmul.f32 %v351_v13, %v350_v14 }
  0xca   :  { %v96_v19 = vmul.f32 %v95_v16, %v88_v17  ;;  %v810_v20 = vmul.f32 %v247_v11, %v88_v17  ;;  %v812_v21 = vsub.f32 %v88_v17, %v351_v13 }
  0xcc   :  { %572 = vmatmul.mubr.f32.vlgmr.msra.gmra.mrb[0].mxu0 %v96_v19  ;;  %577 = vmatmul.mubr.f32.vlgmr.msra.gmra.mrb[0].mxu1 %v810_v20  ;;  %v816_v22 = vmul.f32 %v96_v19, %v801_v12  ;;  %v455_v15 = vmul.f32 %v812_v21, %v812_v21 }
  0xcd   :  { %580 = vmatpush3.xpose.msra.mxu0 %v351_v13  ;;  %581 = vmatprep.mubr.msk.f32.mxu0 %vm713_vm0, %v712_v4 }
  0xd0   :  { %582 = vmatmul.mubr.f32.vlgmr.msra.gmra.mrb[2].mxu0 %v350_v14  ;;  %v320_v14 = vmul.f32 %v793_v5, %v810_v20 }
 0x19f   :  { %v164_v24 = vpop.f32.mrb[0].mxu0  ;;  %v316_v25 = vpop.f32.mrb[0].mxu1 }
 0x1a0   :  { %v573_v26 = vpop.f32.mrb[1].mxu0  ;;  %v578_v27 = vpop.f32.mrb[1].mxu1  ;;  %v173_v28 = vsel %vm172_vm2, %v164_v24, -inf  ;;  %v324_v34 = vsel %vm172_vm2, %v316_v25, -inf }
 0x1a1   :  { %174 = vmax.xlane.f32.xlu1 %v173_v28  ;;  %v214_v29 = vrot.slane %v173_v28, 4 }
 0x1a3   :  { %v215_v31 = vmax.f32 %v173_v28, %v214_v29  ;;  %v418_v32 = vpop.f32.mrb[2].mxu0 }
 0x1a4   :  { %v583_v33 = vpop.f32.mrb[3].mxu0  ;;  %v426_v35 = vsel %vm172_vm2, %v418_v32, -inf }
 0x1a5   :  { %v216_v36 = vrot.slane %v215_v31, 2  ;;  %325 = vmax.xlane.f32.xlu1 %v324_v34  ;;  %427 = vmax.xlane.f32.xlu0 %v426_v35 }
 0x1a7   :  { %v217_v38 = vmax.f32 %v215_v31, %v216_v36 }
 0x1a9   :  { %v218_v39 = vrot.slane %v217_v38, 1 }
 0x1ab   :  { %v219_v42 = vmax.f32 %v217_v38, %v218_v39  ;;  %v453_v38 = vsub.f32 %v801_v12, %v793_v5 }
 0x1ad   :  { %v221_v43 = vmax.f32 %v220_v40, %v219_v42 }
 0x1af   :  { %v226_v44 = vrot.slane %v221_v43, %v225_v41  ;;  %246 = vst.msk [vmem:[#allocation3] sm:$0x1] %vm69_vm1, %v221_v43  ;;  %v239_v47 = vsub.f32 %v220_v40, %v221_v43  ;;  %v466_v43 = vmul.f32 %v453_v38, %v453_v38 }
 0x1b1   :  { %v228_v45 = vsub.f32 %v164_v24, %v226_v44  ;;  %v240_v48 = vmul.f32 1.442695, %v239_v47 }
 0x1b3   :  { %v229_v46 = vmul.f32 1.442695, %v228_v45 }
 0x1b5   :  { %610 = vpow2.f32 %v229_v46 }
 0x1b6   :  { %612 = vpow2.f32 %v240_v48  ;;  %v485_v41 = vld [vmem:[#allocation3] sm:$0x1] }
 0x1bf   :  { %v611_v49 = vpop.eup %610 }
 0x1c0   :  { %v231_v50 = vsel %vm172_vm2, %v611_v49, 0.0  ;;  %v613_v55 = vpop.eup %612 }
 0x1c1   :  { %v232_v51 = vrot.slane %v231_v50, 4  ;;  %v242_v59 = vmul.f32 %v613_v55, %v238_v56 }
 0x1c3   :  { %v233_v52 = vadd.f32 %v232_v51, %v231_v50 }
 0x1c5   :  { %v234_v53 = vrot.slane %v233_v52, 2 }
 0x1c7   :  { %v235_v54 = vadd.f32 %v234_v53, %v233_v52 }
 0x1c9   :  { %v236_v57 = vrot.slane %v235_v54, 1 }
 0x1cb   :  { %v237_v58 = vadd.f32 %v236_v57, %v235_v54 }
 0x1cd   :  { %v243_v60 = vadd.f32 %v242_v59, %v237_v58 }
 0x1cf   :  { %245 = vst.msk [vmem:[#allocation4] sm:$0x1] %vm69_vm1, %v243_v60 }
 0x1d6   :  { %v482_v23 = vld [vmem:[#allocation4] sm:$0x1] }
 0x22e   :  { %v175_v61 = vpop.xlane.xlu1 %174 }
 0x22f   :  { %v176_v62 = vsub.f32 %v164_v24, %v175_v61 }
 0x231   :  { %v177_v63 = vmul.f32 1.442695, %v176_v62 }
 0x232   :  { %v326_v0 = vpop.xlane.xlu1 %325  ;;  %v428_v1 = vpop.xlane.xlu0 %427 }
 0x233   :  { %614 = vpow2.f32 %v177_v63  ;;  %v327_v2 = vsub.f32 %v316_v25, %v326_v0  ;;  %v429_v3 = vsub.f32 %v418_v32, %v428_v1 }
 0x235   :  { %v328_v4 = vmul.f32 1.442695, %v327_v2  ;;  %v430_v6 = vmul.f32 1.442695, %v429_v3 }
 0x237   :  { %616 = vpow2.f32 %v328_v4 }
 0x238   :  { %618 = vpow2.f32 %v430_v6 }
 0x23d   :  { %v615_v7 = vpop.eup %614 }
 0x23e   :  { %v179_v8 = vsel %vm172_vm2, %v615_v7, 0.0 }
 0x23f   :  { %180 = vadd.xlane.f32.xlu1 %v179_v8 }
 0x241   :  { %v617_v9 = vpop.eup %616 }
 0x242   :  { %v619_v10 = vpop.eup %618  ;;  %v330_v11 = vsel %vm172_vm2, %v617_v9, 0.0 }
 0x243   :  { %331 = vadd.xlane.f32.xlu0 %v330_v11  ;;  %v432_v13 = vsel %vm172_vm2, %v619_v10, 0.0 }
 0x244   :  { %433 = vadd.xlane.f32.xlu1 %v432_v13 }
 0x247   :  { %169 = vadd.xlane.f32.xlu0 %v816_v22 }
 0x248   :  { %321 = vadd.xlane.f32.xlu1 %v320_v14 }
 0x24b   :  { %423 = vadd.xlane.f32.xlu0 %v808_v18 }
 0x24c   :  { %456 = vadd.xlane.f32.xlu1 %v455_v15 }
 0x2cc   :  { %v181_v16 = vpop.xlane.xlu1 %180 }
 0x2cd   :  { %620 = vlog2.f32 %v181_v16 }
 0x2d0   :  { %v332_v17 = vpop.xlane.xlu0 %331 }
 0x2d1   :  { %v434_v19 = vpop.xlane.xlu1 %433  ;;  %622 = vlog2.f32 %v332_v17 }
 0x2d2   :  { %624 = vlog2.f32 %v434_v19 }
 0x2d3   :  { %626 = vlog2.f32 %v482_v23 }
 0x2d4   :  { %v170_v24 = vpop.xlane.xlu0 %169 }
 0x2d5   :  { %v201_v20 = vsel %vm186_vm3, %v170_v24, 0.0  ;;  %v322_v31 = vpop.xlane.xlu1 %321 }
 0x2d6   :  { %202 = vadd.xlane.f32.xlu0 %v201_v20 }
 0x2d7   :  { %v621_v22 = vpop.eup %620 }
 0x2d8   :  { %v183_v25 = vmul.f32 0.6931472, %v621_v22  ;;  %v424_v34 = vpop.xlane.xlu0 %423 }
 0x2d9   :  { %v457_v47 = vpop.xlane.xlu1 %456 }
 0x2da   :  { %v184_v29 = vadd.f32 %v183_v25, %v175_v61  ;;  %v458_v49 = vrot.slane %v457_v47, 4 }
 0x2db   :  { %v623_v26 = vpop.eup %622 }
 0x2dc   :  { %v625_v21 = vpop.eup %624  ;;  %v334_v27 = vmul.f32 0.6931472, %v623_v26  ;;  %v185_v36 = vsub.f32 %v184_v29, %v170_v24  ;;  %v459_v53 = vadd.f32 %v458_v49, %v457_v47 }
 0x2dd   :  { %v436_v18 = vmul.f32 0.6931472, %v625_v21  ;;  %v627_v30 = vpop.eup %626 }
 0x2de   :  { %v335_v28 = vadd.f32 %v334_v27, %v326_v0  ;;  %v484_v39 = vmul.f32 0.6931472, %v627_v30  ;;  %v187_v42 = vsel %vm186_vm3, %v185_v36, 0.0  ;;  %v460_v63 = vrot.slane %v459_v53, 2 }
 0x2df   :  { %v437_v32 = vadd.f32 %v436_v18, %v428_v1 }
 0x2e0   :  { %v336_v33 = vsub.f32 %v335_v28, %v322_v31  ;;  %v486_v44 = vadd.f32 %v485_v41, %v484_v39  ;;  %v461_v13 = vadd.f32 %v460_v63, %v459_v53 }
 0x2e1   :  { %v438_v35 = vsub.f32 %v437_v32, %v424_v34 }
 0x2e2   :  { %v337_v37 = vsel %vm186_vm3, %v336_v33, 0.0  ;;  %v487_v45 = vsel %vm69_vm1, %v486_v44, 0.0  ;;  %v462_v25 = vrot.slane %v461_v13, 1 }
 0x2e3   :  { %338 = vadd.xlane.f32.xlu1 %v337_v37  ;;  %v439_v40 = vsel %vm186_vm3, %v438_v35, 0.0 }
 0x2e4   :  { %440 = vadd.xlane.f32.xlu0 %v439_v40  ;;  %v463_v29 = vadd.f32 %v462_v25, %v461_v13 }
 0x2e7   :  { %188 = vadd.xlane.f32.xlu1 %v187_v42 }
 0x2e8   :  { %467 = vadd.xlane.f32.xlu0 %v466_v43 }
 0x2eb   :  { %488 = vadd.xlane.f32.xlu1 %v487_v45 }
 0x363   :  { %v203_v46 = vpop.xlane.xlu0 %202 }
 0x364   :  { %v204_v48 = vrot.slane %v203_v46, 4 }
 0x366   :  { %v205_v5 = vadd.f32 %v204_v48, %v203_v46 }
 0x368   :  { %v206_v55 = vrot.slane %v205_v5, 2 }
 0x36a   :  { %v207_v3 = vadd.f32 %v206_v55, %v205_v5 }
 0x36c   :  { %v208_v15 = vrot.slane %v207_v3, 1 }
 0x36e   :  { %v209_v26 = vadd.f32 %v208_v15, %v207_v3 }
 0x370   :  { %v339_v12 = vpop.xlane.xlu1 %338 }
 0x371   :  { %v340_v50 = vrot.slane %v339_v12, 4  ;;  %v441_v51 = vpop.xlane.xlu0 %440 }
 0x372   :  { %v442_v52 = vrot.slane %v441_v51, 4 }
 0x373   :  { %v341_v54 = vadd.f32 %v340_v50, %v339_v12 }
 0x374   :  { %v443_v56 = vadd.f32 %v442_v52, %v441_v51  ;;  %v189_v57 = vpop.xlane.xlu1 %188 }
 0x375   :  { %v342_v58 = vrot.slane %v341_v54, 2  ;;  %v190_v59 = vrot.slane %v189_v57, 4  ;;  %v468_v60 = vpop.xlane.xlu0 %467 }
 0x376   :  { %v444_v61 = vrot.slane %v443_v56, 2  ;;  %v469_v62 = vrot.slane %v468_v60, 4 }
 0x377   :  { %v191_v0 = vadd.f32 %v190_v59, %v189_v57  ;;  %v343_v7 = vadd.f32 %v342_v58, %v341_v54 }
 0x378   :  { %v470_v1 = vadd.f32 %v469_v62, %v468_v60  ;;  %v489_v2 = vpop.xlane.xlu1 %488  ;;  %v445_v9 = vadd.f32 %v444_v61, %v443_v56 }
 0x379   :  { %v192_v4 = vrot.slane %v191_v0, 2  ;;  %v490_v6 = vrot.slane %v489_v2, 4  ;;  %v344_v19 = vrot.slane %v343_v7, 1 }
 0x37a   :  { %v471_v8 = vrot.slane %v470_v1, 2  ;;  %v446_v23 = vrot.slane %v445_v9, 1 }
 0x37b   :  { %v491_v10 = vadd.f32 %v490_v6, %v489_v2  ;;  %v193_v11 = vadd.f32 %v192_v4, %v191_v0  ;;  %v345_v21 = vadd.f32 %v344_v19, %v343_v7 }
 0x37c   :  { %v472_v14 = vadd.f32 %v471_v8, %v470_v1  ;;  %v447_v18 = vadd.f32 %v446_v23, %v445_v9 }
 0x37d   :  { %v492_v16 = vrot.slane %v491_v10, 2  ;;  %v194_v17 = vrot.slane %v193_v11, 1 }
 0x37e   :  { %v473_v24 = vrot.slane %v472_v14, 1 }
 0x37f   :  { %v493_v20 = vadd.f32 %v492_v16, %v491_v10  ;;  %v195_v22 = vadd.f32 %v194_v17, %v193_v11 }
 0x380   :  { %v474_v28 = vadd.f32 %v473_v24, %v472_v14 }
 0x381   :  { %584 = vpush %v195_v22  ;;  %v494_v27 = vrot.slane %v493_v20, 1 }
 0x382   :  { %586 = vpush %v209_v26 }
 0x383   :  { %588 = vpush %v345_v21  ;;  %v495_v30 = vadd.f32 %v494_v27, %v493_v20 }
 0x384   :  { %590 = vpush %v447_v18 }
 0x385   :  { %592 = vpush %v463_v29 }
 0x386   :  { %594 = vpush %v474_v28 }
 0x387   :  { %596 = vpush %v495_v30 }
 0x3b2   :  { %s585_s0 = spop %584 }
 0x3b3   :  { %s587_s1 = spop %586  ;;  %s498_s18 = smul.f32 0.125, %s585_s0 }
 0x3b4   :  { %s589_s11 = spop %588 }
 0x3b5   :  { %s591_s12 = spop %590 }
 0x3b6   :  { %s512_s13 = sadd.f32 %s591_s12, %s589_s11  ;;  %s593_s14 = spop %592 }
 0x3b7   :  { %s595_s15 = spop %594 }
 0x3b8   :  { %s513_s16 = smul.f32 0.5, %s512_s13  ;;  %s476_s17 = sadd.f32 %s595_s15, %s593_s14 }
 0x3b9   :  { %s597_s19 = spop %596 }
 0x3ba   :  { %s514_s20 = smul.f32 0.125, %s513_s16  ;;  %s500_s21 = ssub.f32 %s597_s19, %s587_s1 }
 0x3bb   :  { %s507_s22 = smul.f32 0.001953125, %s476_s17 }
 0x3bc   :  { %s501_s23 = smul.f32 0.125, %s500_s21  ;;  %516 = sst [smem:[#allocation16]] %s514_s20 }
 0x3bd   :  { %509 = sst [smem:[#allocation14]] %s507_s22 }
 0x3be   :  { %s502_s24 = sadd.f32 %s501_s23, %s498_s18 }
 0x3bf   :  { %681 = shalt.err (!%p678_p4)
}
 0x3c0   :  { %s715_s10 = smov [#allocation14]   ;;  %s503_s5 = smul.f32 0.5, %s502_s24 }
 0x3c1   :  { %532 = dma.smem_to_hbm %s715_s10, 16, %s886_s7, [#allocation15]  }
 0x3c2   :  { %s682_s1 = scalar_lea.hbm %s887_s8, 16 }
 0x3c3   :  { %p683_p5 = scmp.ne.s32.totalorder %s887_s8, %s682_s1  ;;  %p686_p6 = scmp.lt.u32.totalorder %s682_s1, %s887_s8 }
 0x3c5   :  { %p688_p7 = pnand %p686_p6, %p683_p5 }
 0x3c7   :  { %691 = shalt.err (!%p688_p7)
}
 0x3c8   :  { %s716_s15 = smov [#allocation16]   ;;  %505 = sst [smem:[#allocation13]] %s503_s5 }
 0x3c9   :  { %540 = dma.smem_to_hbm %s716_s15, 16, %s887_s8, [#allocation15]  }
 0x3ca   :  { %s692_s19 = scalar_lea.hbm %s885_s6, 16 }
 0x3cb   :  { %p693_p8 = scmp.ne.s32.totalorder %s885_s6, %s692_s19  ;;  %p696_p9 = scmp.lt.u32.totalorder %s692_s19, %s885_s6 }
 0x3cd   :  { %p698_p10 = pnand %p696_p9, %p693_p8 }
 0x3cf   :  { %701 = shalt.err (!%p698_p10)
}
 0x3d0   :  { %s717_s24 = smov [#allocation13]  }
 0x3d1   :  { %524 = dma.smem_to_hbm %s717_s24, 16, %s885_s6, [#allocation10]  }
 0x3d2   :  { %706 = dma.done.wait [#allocation10], 16  }
 0x3d3   :  { %707 = vsyncadd [#allocation10], 4294967280 }
 0x3d4   :  { %708 = dma.done.wait [#allocation15], 32  }
 0x3d5   :  { %709 = vsyncadd [#allocation15], 4294967264 }
 0x3d6   :  { %550 = sfence }
 0x3d7   :  { %551 = vsyncpa [#allocation9], 1 }
 0x3d8   :  { %552 = vsyncpa [#allocation12], 1 }
 0x3d9   :  { %553 = vsyncpa [#allocation10], 1 }
 0x3da   :  { %554 = vsyncpa [#allocation15], 1 }

</bundles_post_ra>
